<compile_context>
chip_gen: v7x
topology: tpu7x:2x2x1
jax: 0.10.0
libtpu: 0.0.40
codegen_flags: <defaults>
</compile_context>

<pallas_src>
import functools
import math

import jax
import jax.numpy as jnp
from jax import lax
from jax.experimental import pallas as pl
from jax.experimental.pallas import tpu as pltpu


def _ceil_to(x, m):
    return ((x + m - 1) // m) * m


def motion_block_kernel(x_ref, wt_ref, w0_ref, svec_ref, dvec_ref, o_ref, *, dim):
    """Block shapes:
       x_ref/o_ref : (TB, Dw, S) f32   -- Dw = dim rounded up to a multiple of 8
       wt_ref/w0_ref: (S, S) f32       -- pre-transposed (in, out)
       svec_ref    : (4, S) f32        -- rows: [bt, at, bet, b0]
       dvec_ref    : (Dw, 2) f32       -- cols: [a0, be0] (rows >= dim unused)
    """
    eps = 1e-5
    tb, d_w, s = x_ref.shape
    rows = tb * d_w

    x3 = x_ref[...]                        # (TB, Dw, S)
    x2 = x3.reshape(rows, s)               # layout-trivial: Dw % 8 == 0

    # --- fc_temporal: y = x @ Wt^T + bt ---
    y = jnp.dot(x2, wt_ref[...], preferred_element_type=jnp.float32)
    y = y + svec_ref[0:1, :]

    # --- norm_temporal = LN_v2(seq): normalize over the last (seq) axis ---
    m_t = jnp.mean(y, axis=-1, keepdims=True)
    yc = y - m_t
    v_t = jnp.mean(yc * yc, axis=-1, keepdims=True)
    y = yc * lax.rsqrt(v_t + eps)
    y = y * svec_ref[1:2, :] + svec_ref[2:3, :]

    # --- fc0: x_ = (x + y) @ W0^T + b0 ---
    z = x2 + y
    x_ = jnp.dot(z, w0_ref[...], preferred_element_type=jnp.float32)
    x_ = x_ + svec_ref[3:4, :]

    # --- norm0 = LN(dim): per-sample normalization over the dim axis ---
    x_3 = x_.reshape(tb, d_w, s)
    if d_w == dim:
        # No D padding: plain stats over the full dim axis.
        m_d = jnp.mean(x_3, axis=1, keepdims=True)
        xc = x_3 - m_d
        v_d = jnp.mean(xc * xc, axis=1, keepdims=True)
    else:
        # Mask the zero-padded rows out of the statistics.
        inv_d = 1.0 / dim
        row_mask = lax.broadcasted_iota(jnp.int32, (d_w, s), 0) < dim
        xm = jnp.where(row_mask, x_3, 0.0)
        m_d = jnp.sum(xm, axis=1, keepdims=True) * inv_d
        xc = jnp.where(row_mask, x_3 - m_d, 0.0)
        v_d = jnp.sum(xc * xc, axis=1, keepdims=True) * inv_d
    xn = (x_3 - m_d) * lax.rsqrt(v_d + eps)
    xn = xn * dvec_ref[:, 0:1] + dvec_ref[:, 1:2]

    # --- residual ---
    o_ref[...] = x3 + xn


def _vmem_capacity_bytes():
    try:
        cap = int(pltpu.get_tpu_info().vmem_capacity_bytes)
    except Exception:
        cap = 64 * 2**20            # conservative (v7x-sized) fallback
    return max(32 * 2**20, min(cap, 128 * 2**20))


def motion_block(x, params, *, block_batch=None):
    """x: (B, D, S).  params = (wt, bt, at, bet, w0, b0, a0, be0), torch layout."""
    B, D, S = x.shape
    wt, bt, at, bet, w0, b0, a0, be0 = params

    D_w = _ceil_to(D, 8)

    # Pre-transpose the (seq, seq) weights once, outside the kernel.
    wtT = wt.T.astype(jnp.float32)
    w0T = w0.T.astype(jnp.float32)

    # Pack per-seq vectors [bt, at, bet, b0] into one lane-dense (4, S) slab,
    # per-dim vectors [a0, be0] into one (D_w, 2) slab.
    svec = jnp.stack([bt, at, bet, b0], axis=0).astype(jnp.float32)
    dvec = jnp.zeros((D_w, 2), jnp.float32)
    dvec = dvec.at[:D, 0].set(a0.astype(jnp.float32))
    dvec = dvec.at[:D, 1].set(be0.astype(jnp.float32))

    # Only the dim axis is (zero-)padded, and only when needed for the
    # layout-trivial (TB, Dw, S) -> (TB*Dw, S) reshape.  S and B are never
    # padded, so HBM traffic stays at the dense tensor size.
    x_in = x.astype(jnp.float32)
    if D_w != D:
        x_in = jnp.pad(x_in, ((0, 0), (0, D_w - D), (0, 0)))

    bytes_per_sample = D_w * S * 4

    # Batch-tile sizing: target ~2-4 MiB x blocks (DMA efficiency) inside a
    # generation-aware VMEM budget, and keep >= 2 grid steps so v7x's two
    # TensorCores both get work on the "parallel" batch axis.
    vmem_cap = _vmem_capacity_bytes()
    if block_batch is not None:
        TB = int(max(1, min(block_batch, B)))
    else:
        per_block_cap = max(bytes_per_sample, int(0.06 * vmem_cap))
        dma_target = 4 * 2**20 if vmem_cap >= 96 * 2**20 else 2 * 2**20
        target = min(dma_target, per_block_cap)
        TB = max(1, target // bytes_per_sample)
        TB = min(TB, pl.cdiv(B, 2))          # >= 2 grid steps (v7x megacore)
        TB = int(max(1, min(TB, B)))

    grid_b = pl.cdiv(B, TB)
    vmem_limit = int(0.75 * vmem_cap)

    kernel = functools.partial(motion_block_kernel, dim=D)

    out = pl.pallas_call(
        kernel,
        out_shape=jax.ShapeDtypeStruct((B, D_w, S), jnp.float32),
        grid_spec=pltpu.PrefetchScalarGridSpec(
            num_scalar_prefetch=0,
            grid=(grid_b,),
            in_specs=[
                pl.BlockSpec((TB, D_w, S), lambda b: (b, 0, 0)),   # x
                pl.BlockSpec((S, S), lambda b: (0, 0)),            # Wt^T (grid-invariant)
                pl.BlockSpec((S, S), lambda b: (0, 0)),            # W0^T (grid-invariant)
                pl.BlockSpec((4, S), lambda b: (0, 0)),            # packed seq vectors
                pl.BlockSpec((D_w, 2), lambda b: (0, 0)),          # packed dim vectors
            ],
            out_specs=pl.BlockSpec((TB, D_w, S), lambda b: (b, 0, 0)),
        ),
        compiler_params=pltpu.CompilerParams(
            dimension_semantics=("parallel",),
            vmem_limit_bytes=vmem_limit,
        ),
    )(x_in, wtT, w0T, svec, dvec)

    if D_w != D:
        out = out[:, :D, :]
    return out.astype(x.dtype)


def init_params(key, dim, seq):
    """Matches reset_parameters(): xavier_uniform(gain=1e-8) for fc weights,
       zero biases, ones/zeros for the two LayerNorms."""
    k0, k1 = jax.random.split(key)
    bound = 1e-8 * math.sqrt(6.0 / (seq + seq))
    wt = jax.random.uniform(k0, (seq, seq), jnp.float32, -bound, bound)
    w0 = jax.random.uniform(k1, (seq, seq), jnp.float32, -bound, bound)
    bt = jnp.zeros((seq,), jnp.float32)
    b0 = jnp.zeros((seq,), jnp.float32)
    at = jnp.ones((seq,), jnp.float32)      # LN_v2(seq) alpha
    bet = jnp.zeros((seq,), jnp.float32)    # LN_v2(seq) beta
    a0 = jnp.ones((dim,), jnp.float32)      # LN(dim) alpha
    be0 = jnp.zeros((dim,), jnp.float32)    # LN(dim) beta
    return (wt, bt, at, bet, w0, b0, a0, be0)


def _randomize_params(dim, seq, key, w_scale=1e-4):
    """Non-trivial weights / biases / LN params (forward semantics unchanged)."""
    ks = jax.random.split(key, 8)
    wt = w_scale * jax.random.normal(ks[0], (seq, seq), jnp.float32)
    w0 = w_scale * jax.random.normal(ks[1], (seq, seq), jnp.float32)
    bt = 0.3 * jax.random.normal(ks[2], (seq,), jnp.float32)
    at = 1.0 + 0.2 * jax.random.normal(ks[3], (seq,), jnp.float32)
    bet = 0.3 * jax.random.normal(ks[4], (seq,), jnp.float32)
    b0 = 0.3 * jax.random.normal(ks[5], (seq,), jnp.float32)
    a0 = 1.0 + 0.2 * jax.random.normal(ks[6], (dim,), jnp.float32)
    be0 = 0.3 * jax.random.normal(ks[7], (dim,), jnp.float32)
    return (wt, bt, at, bet, w0, b0, a0, be0)


def motion_block_ref(x, params):
    """Pure-JAX (f32) reference mirroring the torch forward."""
    wt, bt, at, bet, w0, b0, a0, be0 = params
    eps = 1e-5
    hi = jax.lax.Precision.HIGHEST
    y = jnp.einsum('bds,ts->bdt', x, wt, precision=hi) + bt
    m = y.mean(-1, keepdims=True)
    v = ((y - m) ** 2).mean(-1, keepdims=True)
    y = (y - m) / jnp.sqrt(v + eps) * at + bet
    z = x + y
    x_ = jnp.einsum('bds,ts->bdt', z, w0, precision=hi) + b0
    m0 = x_.mean(1, keepdims=True)
    v0 = ((x_ - m0) ** 2).mean(1, keepdims=True)
    x_ = (x_ - m0) / jnp.sqrt(v0 + eps) * a0[None, :, None] + be0[None, :, None]
    return x + x_


if __name__ == "__main__":
    key = jax.random.PRNGKey(0)
    kx1, kp1, kx2, kp2, kx3, kp3 = jax.random.split(key, 6)

    # --- Case 1: module-default small shapes (batch=2, dim=4, seq=8),
    #     default torch init (gain=1e-8 weights, identity LayerNorms). ---
    B, D, S = 2, 4, 8
    x = jax.random.normal(kx1, (B, D, S), jnp.float32)
    params = init_params(kp1, D, S)
    out = jax.block_until_ready(motion_block(x, params))
    ref = motion_block_ref(x, params)
    assert out.shape == (B, D, S)
    err = float(jnp.max(jnp.abs(out - ref)))
    assert jnp.allclose(out, ref, atol=1e-4, rtol=1e-4), f"case1 max err {err}"

    # --- Case 2: non-aligned dims + forced small batch tile: exercises the
    #     D->8 pad/mask path, a multi-step grid, and a partial edge block. ---
    B2, D2, S2 = 5, 6, 20
    x2 = jax.random.normal(kx2, (B2, D2, S2), jnp.float32)
    params2 = _randomize_params(D2, S2, kp2)
    out2 = jax.block_until_ready(motion_block(x2, params2, block_batch=2))
    ref2 = motion_block_ref(x2, params2)
    assert out2.shape == (B2, D2, S2)
    err2 = float(jnp.max(jnp.abs(out2 - ref2)))
    assert jnp.allclose(out2, ref2, atol=1e-4, rtol=1e-4), f"case2 max err {err2}"

    # --- Case 3: dim already a multiple of 8 (completely pad/slice free),
    #     auto batch-tile sizing, partial last block. ---
    B3, D3, S3 = 7, 16, 48
    x3 = jax.random.normal(kx3, (B3, D3, S3), jnp.float32)
    params3 = _randomize_params(D3, S3, kp3)
    out3 = jax.block_until_ready(motion_block(x3, params3))
    ref3 = motion_block_ref(x3, params3)
    assert out3.shape == (B3, D3, S3)
    err3 = float(jnp.max(jnp.abs(out3 - ref3)))
    assert jnp.allclose(out3, ref3, atol=1e-4, rtol=1e-4), f"case3 max err {err3}"

    print("KERNEL_OK")
</pallas_src>

<mosaic_0001>
module attributes {stable_mosaic.version = 11 : i64} {
  func.func @motion_block_kernel(%arg0: i32, %arg1: memref<1x8x8xf32, #tpu.memory_space<vmem>>, %arg2: memref<8x8xf32, #tpu.memory_space<vmem>>, %arg3: memref<8x8xf32, #tpu.memory_space<vmem>>, %arg4: memref<4x8xf32, #tpu.memory_space<vmem>>, %arg5: memref<8x2xf32, #tpu.memory_space<vmem>>, %arg6: memref<1x8x8xf32, #tpu.memory_space<vmem>>) attributes {dimension_semantics = [#tpu.dimension_semantics<parallel>], iteration_bounds = array<i64: 2>, scalar_prefetch = 0 : i64, scratch_operands = 0 : i64, tpu.core_type = #tpu.core_type<tc>, window_params = [{transform_indices = @transform_0, window_bounds = array<i64: 1, 8, 8>}, {pipeline_mode = #tpu.pipeline_mode<synchronous>, transform_indices = @transform_1, window_bounds = array<i64: 8, 8>}, {pipeline_mode = #tpu.pipeline_mode<synchronous>, transform_indices = @transform_2, window_bounds = array<i64: 8, 8>}, {pipeline_mode = #tpu.pipeline_mode<synchronous>, transform_indices = @transform_3, window_bounds = array<i64: 4, 8>}, {pipeline_mode = #tpu.pipeline_mode<synchronous>, transform_indices = @transform_4, window_bounds = array<i64: 8, 2>}, {transform_indices = @transform_5, window_bounds = array<i64: 1, 8, 8>}]} {
    %c0 = arith.constant 0 : index
    %c0_0 = arith.constant 0 : index
    %c0_1 = arith.constant 0 : index
    %0 = vector.load %arg1[%c0, %c0_0, %c0_1] : memref<1x8x8xf32, #tpu.memory_space<vmem>>, vector<1x8x8xf32>
    %1 = vector.shape_cast %0 : vector<1x8x8xf32> to vector<8x8xf32>
    %c0_2 = arith.constant 0 : index
    %c0_3 = arith.constant 0 : index
    %2 = vector.load %arg2[%c0_2, %c0_3] : memref<8x8xf32, #tpu.memory_space<vmem>>, vector<8x8xf32>
    %cst = arith.constant dense<0.000000e+00> : vector<8x8xf32>
    %3 = tpu.matmul %1, %2, %cst {dimension_numbers = #tpu.dot_dimension_numbers<[1], [0], [0], [1], [0, 0, 1, 1], [], []>} : vector<8x8xf32>, vector<8x8xf32>, vector<8x8xf32> -> vector<8x8xf32>
    %c0_4 = arith.constant 0 : index
    %c0_5 = arith.constant 0 : index
    %4 = vector.load %arg4[%c0_4, %c0_5] : memref<4x8xf32, #tpu.memory_space<vmem>>, vector<1x8xf32>
    %5 = vector.broadcast %4 : vector<1x8xf32> to vector<8x8xf32>
    %6 = arith.addf %3, %5 : vector<8x8xf32>
    %cst_6 = arith.constant dense<0.000000e+00> : vector<8xf32>
    %7 = vector.multi_reduction <add>, %6, %cst_6 [1] : vector<8x8xf32> to vector<8xf32>
    %8 = vector.shape_cast %7 : vector<8xf32> to vector<8x1xf32>
    %cst_7 = arith.constant 8.000000e+00 : f32
    %9 = vector.broadcast %cst_7 : f32 to vector<8x1xf32>
    %10 = arith.divf %8, %9 : vector<8x1xf32>
    %11 = vector.broadcast %10 : vector<8x1xf32> to vector<8x8xf32>
    %12 = arith.subf %6, %11 : vector<8x8xf32>
    %13 = arith.mulf %12, %12 : vector<8x8xf32>
    %cst_8 = arith.constant dense<0.000000e+00> : vector<8xf32>
    %14 = vector.multi_reduction <add>, %13, %cst_8 [1] : vector<8x8xf32> to vector<8xf32>
    %15 = vector.shape_cast %14 : vector<8xf32> to vector<8x1xf32>
    %cst_9 = arith.constant 8.000000e+00 : f32
    %16 = vector.broadcast %cst_9 : f32 to vector<8x1xf32>
    %17 = arith.divf %15, %16 : vector<8x1xf32>
    %cst_10 = arith.constant 9.99999974E-6 : f32
    %18 = vector.broadcast %cst_10 : f32 to vector<8x1xf32>
    %19 = arith.addf %17, %18 : vector<8x1xf32>
    %20 = math.rsqrt %19 : vector<8x1xf32>
    %21 = vector.broadcast %20 : vector<8x1xf32> to vector<8x8xf32>
    %22 = arith.mulf %12, %21 : vector<8x8xf32>
    %c1 = arith.constant 1 : index
    %c0_11 = arith.constant 0 : index
    %23 = vector.load %arg4[%c1, %c0_11] : memref<4x8xf32, #tpu.memory_space<vmem>>, vector<1x8xf32>
    %24 = vector.broadcast %23 : vector<1x8xf32> to vector<8x8xf32>
    %25 = arith.mulf %22, %24 : vector<8x8xf32>
    %c2 = arith.constant 2 : index
    %c0_12 = arith.constant 0 : index
    %26 = vector.load %arg4[%c2, %c0_12] : memref<4x8xf32, #tpu.memory_space<vmem>>, vector<1x8xf32>
    %27 = vector.broadcast %26 : vector<1x8xf32> to vector<8x8xf32>
    %28 = arith.addf %25, %27 : vector<8x8xf32>
    %29 = arith.addf %1, %28 : vector<8x8xf32>
    %c0_13 = arith.constant 0 : index
    %c0_14 = arith.constant 0 : index
    %30 = vector.load %arg3[%c0_13, %c0_14] : memref<8x8xf32, #tpu.memory_space<vmem>>, vector<8x8xf32>
    %cst_15 = arith.constant dense<0.000000e+00> : vector<8x8xf32>
    %31 = tpu.matmul %29, %30, %cst_15 {dimension_numbers = #tpu.dot_dimension_numbers<[1], [0], [0], [1], [0, 0, 1, 1], [], []>} : vector<8x8xf32>, vector<8x8xf32>, vector<8x8xf32> -> vector<8x8xf32>
    %c3 = arith.constant 3 : index
    %c0_16 = arith.constant 0 : index
    %32 = vector.load %arg4[%c3, %c0_16] : memref<4x8xf32, #tpu.memory_space<vmem>>, vector<1x8xf32>
    %33 = vector.broadcast %32 : vector<1x8xf32> to vector<8x8xf32>
    %34 = arith.addf %31, %33 : vector<8x8xf32>
    %35 = vector.shape_cast %34 : vector<8x8xf32> to vector<1x8x8xf32>
    %36 = tpu.iota {dimensions = array<i32: 0>} : vector<8x8xi32>
    %c4_i32 = arith.constant 4 : i32
    %37 = vector.broadcast %c4_i32 : i32 to vector<8x8xi32>
    %38 = arith.cmpi slt, %36, %37 : vector<8x8xi32>
    %cst_17 = arith.constant 0.000000e+00 : f32
    %39 = vector.shape_cast %38 : vector<8x8xi1> to vector<1x8x8xi1>
    %40 = vector.broadcast %cst_17 : f32 to vector<1x8x8xf32>
    %41 = arith.select %39, %35, %40 : vector<1x8x8xi1>, vector<1x8x8xf32>
    %cst_18 = arith.constant dense<0.000000e+00> : vector<1x8xf32>
    %42 = vector.multi_reduction <add>, %41, %cst_18 [1] : vector<1x8x8xf32> to vector<1x8xf32>
    %43 = vector.shape_cast %42 : vector<1x8xf32> to vector<1x1x8xf32>
    %cst_19 = arith.constant 2.500000e-01 : f32
    %44 = vector.broadcast %cst_19 : f32 to vector<1x1x8xf32>
    %45 = arith.mulf %43, %44 : vector<1x1x8xf32>
    %46 = vector.broadcast %45 : vector<1x1x8xf32> to vector<1x8x8xf32>
    %47 = arith.subf %35, %46 : vector<1x8x8xf32>
    %cst_20 = arith.constant 0.000000e+00 : f32
    %48 = vector.shape_cast %38 : vector<8x8xi1> to vector<1x8x8xi1>
    %49 = vector.broadcast %cst_20 : f32 to vector<1x8x8xf32>
    %50 = arith.select %48, %47, %49 : vector<1x8x8xi1>, vector<1x8x8xf32>
    %51 = arith.mulf %50, %50 : vector<1x8x8xf32>
    %cst_21 = arith.constant dense<0.000000e+00> : vector<1x8xf32>
    %52 = vector.multi_reduction <add>, %51, %cst_21 [1] : vector<1x8x8xf32> to vector<1x8xf32>
    %53 = vector.shape_cast %52 : vector<1x8xf32> to vector<1x1x8xf32>
    %cst_22 = arith.constant 2.500000e-01 : f32
    %54 = vector.broadcast %cst_22 : f32 to vector<1x1x8xf32>
    %55 = arith.mulf %53, %54 : vector<1x1x8xf32>
    %56 = vector.broadcast %45 : vector<1x1x8xf32> to vector<1x8x8xf32>
    %57 = arith.subf %35, %56 : vector<1x8x8xf32>
    %cst_23 = arith.constant 9.99999974E-6 : f32
    %58 = vector.broadcast %cst_23 : f32 to vector<1x1x8xf32>
    %59 = arith.addf %55, %58 : vector<1x1x8xf32>
    %60 = math.rsqrt %59 : vector<1x1x8xf32>
    %61 = vector.broadcast %60 : vector<1x1x8xf32> to vector<1x8x8xf32>
    %62 = arith.mulf %57, %61 : vector<1x8x8xf32>
    %c0_24 = arith.constant 0 : index
    %c0_25 = arith.constant 0 : index
    %63 = vector.load %arg5[%c0_24, %c0_25] : memref<8x2xf32, #tpu.memory_space<vmem>>, vector<8x1xf32>
    %64 = vector.shape_cast %63 : vector<8x1xf32> to vector<1x8x1xf32>
    %65 = vector.broadcast %64 : vector<1x8x1xf32> to vector<1x8x8xf32>
    %66 = arith.mulf %62, %65 : vector<1x8x8xf32>
    %c0_26 = arith.constant 0 : index
    %c1_27 = arith.constant 1 : index
    %67 = vector.load %arg5[%c0_26, %c1_27] : memref<8x2xf32, #tpu.memory_space<vmem>>, vector<8x1xf32>
    %68 = vector.shape_cast %67 : vector<8x1xf32> to vector<1x8x1xf32>
    %69 = vector.broadcast %68 : vector<1x8x1xf32> to vector<1x8x8xf32>
    %70 = arith.addf %66, %69 : vector<1x8x8xf32>
    %71 = arith.addf %0, %70 : vector<1x8x8xf32>
    %c0_28 = arith.constant 0 : index
    %c0_29 = arith.constant 0 : index
    %c0_30 = arith.constant 0 : index
    %72 = vector.load %arg6[%c0_28, %c0_29, %c0_30] : memref<1x8x8xf32, #tpu.memory_space<vmem>>, vector<1x8x8xf32>
    tpu.vector_store %arg6[%c0_28, %c0_29, %c0_30], %71 {strides = array<i32>} : memref<1x8x8xf32, #tpu.memory_space<vmem>>, vector<1x8x8xf32>,
    return
  }
  func.func @transform_0(%arg0: i32) -> (i32, i32, i32) {
    %c0_i32 = arith.constant 0 : i32
    %c0_i32_0 = arith.constant 0 : i32
    %c0_i32_1 = arith.constant 0 : i32
    return %arg0, %c0_i32, %c0_i32_0 : i32, i32, i32
  }
  func.func @transform_1(%arg0: i32) -> (i32, i32) {
    %c0_i32 = arith.constant 0 : i32
    %c0_i32_0 = arith.constant 0 : i32
    %c0_i32_1 = arith.constant 0 : i32
    return %c0_i32, %c0_i32_0 : i32, i32
  }
  func.func @transform_2(%arg0: i32) -> (i32, i32) {
    %c0_i32 = arith.constant 0 : i32
    %c0_i32_0 = arith.constant 0 : i32
    %c0_i32_1 = arith.constant 0 : i32
    return %c0_i32, %c0_i32_0 : i32, i32
  }
  func.func @transform_3(%arg0: i32) -> (i32, i32) {
    %c0_i32 = arith.constant 0 : i32
    %c0_i32_0 = arith.constant 0 : i32
    %c0_i32_1 = arith.constant 0 : i32
    return %c0_i32, %c0_i32_0 : i32, i32
  }
  func.func @transform_4(%arg0: i32) -> (i32, i32) {
    %c0_i32 = arith.constant 0 : i32
    %c0_i32_0 = arith.constant 0 : i32
    %c0_i32_1 = arith.constant 0 : i32
    return %c0_i32, %c0_i32_0 : i32, i32
  }
  func.func @transform_5(%arg0: i32) -> (i32, i32, i32) {
    %c0_i32 = arith.constant 0 : i32
    %c0_i32_0 = arith.constant 0 : i32
    %c0_i32_1 = arith.constant 0 : i32
    return %arg0, %c0_i32, %c0_i32_0 : i32, i32, i32
  }
}

</mosaic_0001>

<bundles_post_ra>
// kernel: tpu_custom_call.1
= control target key start
LH: loop header
LB: loop body
LE: loop exit
PB: predicated region body
PF: predicated region fallthrough
CT: control target
= control target key end

     0   :  { %10 = vsyncpa [#allocation3], 0  ;;  %s972_s0 = inlined_call_operand.hbm [shape: f32[2,8,8], index: 0, kind: input, shape index: {}]   ;;  %s973_s1 = inlined_call_operand.vmem [shape: f32[8,8], index: 1, kind: input, shape index: {}]   ;;  %s974_s2 = inlined_call_operand.vmem [shape: f32[8,8], index: 2, kind: input, shape index: {}]   ;;  %s975_s3 = inlined_call_operand.vmem [shape: f32[4,8], index: 3, kind: input, shape index: {}]   ;;  %s976_s4 = inlined_call_operand.vmem [shape: f32[8,2], index: 4, kind: input, shape index: {}]   ;;  %s977_s5 = inlined_call_operand.hbm [shape: f32[2,8,8], index: 5, kind: output, shape index: {}]  }
   0x1   :  { %12 = vsyncpa [#allocation3 + $0x1], 0 }
   0x2   :  { %13 = vsyncpa [#allocation4], 0 }
   0x3   :  { %15 = vsyncpa [#allocation4 + $0x1], 0  ;;  %s774_s18 = smov 0   ;;  %s776_s19 = smov 0  }
   0x4   :  { %s778_s20 = smov 0   ;;  %s780_s21 = smov 0  }
   0x5 LB: > { %s795_s22 = sadd.s32 4294967295, %s736_s21   ;;  %s551_s23 = sadd.s32 4294967294, %s736_s21   ;;  %s736_s21 = sphi %s780_s21, %s992_s21   ;;  %s732_s20 = sphi %s778_s20, %s991_s20   ;;  %s728_s19 = sphi %s776_s19, %s990_s19   ;;  %s724_s18 = sphi %s774_s18, %s989_s18  }
   0x6   : > { %s799_s24 = sadd.s32 1, %s736_s21   ;;  %s28_s25 = sadd.s32 1, %s732_s20 }
   0x7   : > { %s25_s26 = ssub.s32 %s736_s21, %s799_s24  ;;  %p35_p0 = scmp.ne.s32.totalorder %s732_s20, %s728_s19 }
   0x8   : > { %p26_p1 = scmp.eq.s32.totalorder %s25_s26, 0  ;;  %p36_p2 = scmp.eq.s32.totalorder %s736_s21, 0 }
   0x9   : > { %p41_p3 = scmp.ne.s32.totalorder %s728_s19, %s724_s18  ;;  %p42_p4 = scmp.eq.s32.totalorder %s795_s22, 0 }
   0xa   : > { %s811_s27 = scalar_select %p26_p1, %s732_s20, %s28_s25  }
   0xb   : > { %p813_p5 = por %p36_p2, %p35_p0  ;;  %p817_p6 = por %p42_p4, %p41_p3 }
   0xc   : > { %p149_p7 = scmp.eq.s32.totalorder %s795_s22, 1  ;;  %p155_p8 = scmp.eq.s32.totalorder %s551_s23, 1 }
   0xd   : > { %p595_p10 = scmp.lt.s32.totalorder %s736_s21, 2  ;;  %s187_s7 = sand.u32 1, %s732_s20  }
   0xe   : > { %p824_p11 = por %p149_p7, %p35_p0  ;;  %p828_p12 = por %p155_p8, %p41_p3 }
   0xf   : > { %s555_s8 = sshll.u32 %s736_s21, 7  ;;  %s554_s9 = sshll.u32 %s187_s7, 3 }
  0x10   : > { %s981_s30 = scalar_select %p824_p11, 1, 0 }
  0x11   : > { %s982_s6 = scalar_select %p828_p12, 1, 0 }
  0x12   : > { %s837_s12 = scalar_lea.hbm %s972_s0, %s555_s8  ;;  %s191_s13 = scalar_lea.vmem [#allocation2], %s554_s9 }
  0x13   : > { %s198_s14 = sshll.u32 %s191_s13, 4  ;;  %p841_p13 = pnand %p595_p10, %p813_p5  ;;  %s845_s14 = int_to_ptr.vmem [resolvable:$true] %s198_s14 }
  0x14   : > { %s188_s16 = scalar_lea.sflag [#allocation3], %s187_s7  ;;  %s640_s17 = scalar_lea.hbm %s837_s12, 128 }
  0x15   : > { %p641_p2 = scmp.ne.s32.totalorder %s837_s12, %s640_s17  ;;  %p642_p3 = pneg %p841_p13 }
  0x16   : > { %s645_s26 = scalar_lea.hbm %s972_s0, 256  ;;  %p646_p5 = scmp.lt.u32.totalorder %s837_s12, %s972_s0 }
  0x17   : > { %p643_p4 = pnand %p642_p3, %p641_p2  ;;  %p647_p8 = scmp.lt.u32.totalorder %s645_s26, %s640_s17 }
  0x18   : > { %p649_p9 = scmp.lt.u32.totalorder %s640_s17, %s837_s12 }
  0x19   : > { %p644_p7 = pneg %p643_p4  ;;  %p648_p10 = por %p647_p8, %p646_p5 }
  0x1b   : > { %p650_p0 = por %p649_p9, %p648_p10 }
  0x1d   : > { %p651_p1 = pnand %p650_p0, %p644_p7 }
  0x1f   : > { %654 = shalt.err (!%p651_p1)
}
  0x20   : > { %s655_s7 = scalar_lea.vmem %s845_s14, 128  ;;  %s738_s9 = smov [#allocation2]  }
  0x21   : > { %p656_p2 = scmp.ne.s32.totalorder %s845_s14, %s655_s7  ;;  %s660_s10 = sshll.u32 %s738_s9, 4  ;;  %s661_s10 = int_to_ptr.vmem [resolvable:$false] %s660_s10 }
  0x22   : > { %s662_s11 = scalar_lea.vmem %s661_s10, 256  ;;  %p663_p11 = scmp.lt.s32.totalorder %s845_s14, %s661_s10 }
  0x23   : > { %p658_p4 = pnand %p656_p2, %p642_p3  ;;  %p664_p5 = scmp.lt.s32.totalorder %s662_s11, %s655_s7 }
  0x25   : > { %p659_p12 = pneg %p658_p4  ;;  %p665_p8 = por %p664_p5, %p663_p11 }
  0x27   : > { %p666_p9 = pnand %p665_p8, %p659_p12 }
  0x29   : > { %669 = shalt.err (!%p666_p9)
}
  0x2a   : > { %590 = dma.hbm_to_vmem [thread:$0]  (!%p841_p13), %s837_s12, 128, %s845_s14, %s188_s16  }
  0x2b   : > { %p984_p0 = scmp.lt.s32.totalorder %s736_s21, 3  ;;  %p985_p1 = scmp.ge.s32.totalorder %s736_s21, 1 }
  0x2d   : > { %p204_p3 = pnand %p985_p1, %p984_p0 }
  0x2e   : > { %s879_s13 = sand.u32 (!%p204_p3), 1, %s728_s19  }
  0x2f   : > { %207 = sbr.rel (%p204_p3) target bundleno = 873 (0x369), region = 40  ;;  %s557_s17 = sshll.u32 (!%p204_p3), %s879_s13, 3 }
  0x30   : > { %s210_s23 = scalar_lea.sflag (!%p204_p3), [#allocation3], %s879_s13  ;;  %s213_s15 = scalar_lea.vmem (!%p204_p3), [#allocation2], %s557_s17 }
  0x36   : > { %715 = dma.done.wait (%p817_p6), %s210_s23, 128  }
  0x37   : > { %717 = vsyncadd (%p817_p6), %s210_s23, 4294967168  ;;  %v739_v0 = vmov 0.0   ;;  %vm740_vm0 = vmmov 0   ;;  %vm247_vm1 = vcmask 64512   ;;  %v241_v1 = vld [vmem:[%s973_s1] sm:$0xff]  ;;  %v741_v15 = vmov 0  }
  0x38   : > { %573 = vmatprep.subr.mxu0 %v739_v0  ;;  %575 = vmatprep.mubr.msk.f32.mxu0 %vm740_vm0, %v739_v0  ;;  %v892_v2 = vld [vmem:[%s213_s15] sm:$0xff]  ;;  %v742_v16 = vmov 1   ;;  %v427_v27 = vlaneseq  ;;  %s566_s12 = sshll.u32 %s795_s22, 7  ;;  %s239_s14 = scalar_lea.vmem [#allocation5], %s557_s17 }
  0x39   : > { %578 = vmatprep.subr.mxu1 %v739_v0  ;;  %580 = vmatprep.mubr.msk.f32.mxu1 %vm740_vm0, %v739_v0  ;;  %v559_v3 = vld [vmem:[%s975_s3] ss:$0 sm:$0xff]  ;;  %v561_v21 = vld [vmem:[%s975_s3 + $0x1] ss:$0 sm:$0xff]  ;;  %v562_v23 = vld [vmem:[%s975_s3 + $0x2] ss:$0 sm:$0xff]  ;;  %s927_s26 = scalar_lea.hbm %s977_s5, %s566_s12 }
  0x3a   : > { %574 = vmatpush3.msra.mxu0 %v241_v1  ;;  %v348_v13 = vld [vmem:[%s974_s2] sm:$0xff]  ;;  %633 = vset.pattern.permute.xlu1 %v741_v15  ;;  %v428_v28 = vshrl.u32 %v427_v27, 7  ;;  %s481_s16 = sshll.u32 %s239_s14, 4  ;;  %s468_s28 = scalar_lea.sflag [#allocation4], %s879_s13  ;;  %s929_s16 = int_to_ptr.vmem [resolvable:$true] %s481_s16 }
  0x3b   : > { %576 = vmatmul.mubr.msk.f32.vlgmr.msra.gmra.mrb[0].mxu0 %vm247_vm1, %v892_v2  ;;  %579 = vmatpush3.msra.mxu1 %v348_v13  ;;  %v453_v14 = vld [vmem:[%s976_s4] sm:$0xff]  ;;  %s670_s22 = scalar_lea.vmem %s929_s16, 128  ;;  %p986_p11 = scmp.ne.s32.totalorder %s981_s30, 0 }
  0x3c   : > { %635 = vset.pattern.permute.xlu0 %v742_v16  ;;  %456 = vperm.xlu1 %633, %v453_v14   ;;  %v563_v29 = vld [vmem:[%s975_s3 + $0x3] ss:$0 sm:$0xff]  ;;  %vm429_vm2 = vcmp.lt.s32.totalorder %v428_v28, 4  ;;  %p671_p6 = scmp.ne.s32.totalorder %s929_s16, %s670_s22  ;;  %s743_s17 = smov [#allocation5]  }
  0x3d   : > { %s674_s8 = sshll.u32 %s743_s17, 4  ;;  %s675_s8 = int_to_ptr.vmem [resolvable:$false] %s674_s8 }
  0x3e   : > { %p672_p12 = pnand %p671_p6, %p986_p11  ;;  %s676_s7 = scalar_lea.vmem %s675_s8, 256 }
  0x3f   : > { %p677_p7 = scmp.lt.s32.totalorder %s929_s16, %s675_s8  ;;  %p678_p10 = scmp.lt.s32.totalorder %s676_s7, %s670_s22 }
  0x40   : > { %634 = vset.pattern.permute.xlu1 %v742_v16  ;;  %p673_p13 = pneg %p672_p12 }
  0x41   : > { %461 = vperm.xlu1 %634, %v453_v14   ;;  %p679_p2 = por %p678_p10, %p677_p7 }
  0x43   : > { %p680_p4 = pnand %p679_p2, %p673_p13 }
  0xbb   : > { %v457_v54 = vpop.permute.xlu1 %456 }
  0xc0   : > { %v462_v57 = vpop.permute.xlu1 %461 }
 0x10e   : > { %v317_v4 = vpop.f32.mrb[0].mxu0 }
 0x10f   : > { %v318_v5 = vadd.f32 %v559_v3, %v317_v4  ;;  %v577_v6 = vpop.f32.mrb[1].mxu0 }
 0x111   : > { %v321_v7 = vsel %vm247_vm1, %v318_v5, 0.0 }
 0x112   : > { %322 = vadd.xlane.f32.xlu0 %v321_v7 }
 0x19f   : > { %v323_v8 = vpop.xlane.xlu0 %322 }
 0x1a0   : > { %v325_v9 = vmul.f32 0.125, %v323_v8 }
 0x1a2   : > { %v326_v10 = vsub.f32 %v318_v5, %v325_v9 }
 0x1a4   : > { %v327_v11 = vmul.f32 %v326_v10, %v326_v10 }
 0x1a6   : > { %v328_v12 = vsel %vm247_vm1, %v327_v11, 0.0 }
 0x1a7   : > { %329 = vadd.xlane.f32.xlu0 %v328_v12 }
 0x234   : > { %v330_v17 = vpop.xlane.xlu0 %329 }
 0x235   : > { %v331_v18 = vmul.f32 0.125, %v330_v17 }
 0x237   : > { %v332_v19 = vadd.f32 1e-05, %v331_v18 }
 0x239   : > { %636 = vrsqrt.f32 %v332_v19 }
 0x243   : > { %v637_v20 = vpop.eup %636 }
 0x244   : > { %v334_v22 = vmul.f32 %v637_v20, %v326_v10 }
 0x246   : > { %v340_v24 = vmul.f32 %v561_v21, %v334_v22 }
 0x248   : > { %v346_v25 = vadd.f32 %v562_v23, %v340_v24 }
 0x24a   : > { %v347_v26 = vadd.f32 %v346_v25, %v892_v2 }
 0x24c   : > { %581 = vmatmul.mubr.msk.f32.vlgmr.msra.gmra.mrb[0].mxu1 %vm247_vm1, %v347_v26 }
 0x31f   : > { %v423_v30 = vpop.f32.mrb[0].mxu1 }
 0x320   : > { %v424_v31 = vadd.f32 %v563_v29, %v423_v30  ;;  %v582_v32 = vpop.f32.mrb[1].mxu1 }
 0x322   : > { %v430_v33 = vsel %vm429_vm2, %v424_v31, 0.0 }
 0x323   : > { %v431_v34 = vsel %vm247_vm1, %v430_v33, 0.0 }
 0x324   : > { %v432_v35 = vrot.slane %v431_v34, 4 }
 0x326   : > { %v433_v36 = vadd.f32 %v432_v35, %v431_v34 }
 0x328   : > { %v434_v37 = vrot.slane %v433_v36, 2 }
 0x32a   : > { %v435_v38 = vadd.f32 %v434_v37, %v433_v36 }
 0x32c   : > { %v436_v39 = vrot.slane %v435_v38, 1 }
 0x32e   : > { %v437_v40 = vadd.f32 %v436_v39, %v435_v38 }
 0x330   : > { %v438_v41 = vmul.f32 0.25, %v437_v40 }
 0x332   : > { %v439_v42 = vsub.f32 %v424_v31, %v438_v41 }
 0x334   : > { %v440_v43 = vsel %vm429_vm2, %v439_v42, 0.0 }
 0x335   : > { %v441_v44 = vmul.f32 %v440_v43, %v440_v43 }
 0x337   : > { %v442_v45 = vsel %vm247_vm1, %v441_v44, 0.0 }
 0x338   : > { %v443_v46 = vrot.slane %v442_v45, 4 }
 0x33a   : > { %v444_v47 = vadd.f32 %v443_v46, %v442_v45 }
 0x33c   : > { %v445_v48 = vrot.slane %v444_v47, 2 }
 0x33e   : > { %v446_v49 = vadd.f32 %v445_v48, %v444_v47 }
 0x340   : > { %v447_v50 = vrot.slane %v446_v49, 1 }
 0x342   : > { %v448_v51 = vadd.f32 %v447_v50, %v446_v49 }
 0x344   : > { %v449_v52 = vmul.f32 0.25, %v448_v51 }
 0x346   : > { %v450_v53 = vadd.f32 1e-05, %v449_v52 }
 0x348   : > { %638 = vrsqrt.f32 %v450_v53 }
 0x352   : > { %v639_v55 = vpop.eup %638 }
 0x353   : > { %v452_v56 = vmul.f32 %v639_v55, %v439_v42 }
 0x355   : > { %v459_v58 = vmul.f32 %v457_v54, %v452_v56 }
 0x357   : > { %v464_v59 = vadd.f32 %v462_v57, %v459_v58 }
 0x359   : > { %v465_v60 = vadd.f32 %v464_v59, %v892_v2 }
 0x35b   : > { %466 = vst.msk [vmem:[%s239_s14] sm:$0xff] %vm247_vm1, %v465_v60 }
 0x35c   : > { %683 = shalt.err (!%p680_p4)
}
 0x35d   : > { %s684_s13 = scalar_lea.hbm %s927_s26, 128  ;;  %s688_s11 = scalar_lea.hbm %s977_s5, 256 }
 0x35e   : > { %p685_p5 = scmp.ne.s32.totalorder %s927_s26, %s684_s13  ;;  %p689_p0 = scmp.lt.u32.totalorder %s927_s26, %s977_s5 }
 0x35f   : > { %p690_p1 = scmp.lt.u32.totalorder %s688_s11, %s684_s13  ;;  %p692_p6 = scmp.lt.u32.totalorder %s684_s13, %s927_s26 }
 0x360   : > { %p686_p8 = pnand %p685_p5, %p986_p11 }
 0x361   : > { %p691_p3 = por %p690_p1, %p689_p0 }
 0x362   : > { %p687_p9 = pneg %p686_p8 }
 0x363   : > { %p693_p12 = por %p692_p6, %p691_p3 }
 0x365   : > { %p694_p13 = pnand %p693_p12, %p687_p9 }
 0x367   : > { %697 = shalt.err (!%p694_p13)
}
 0x368   : > { %585 = dma.vmem_to_hbm [thread:$0]  (%p986_p11), %s929_s16, 128, %s927_s26, %s468_s28  }
 0x369 PF: > { %s493_s12 = sand.u32 1, %s724_s18   ;;  %p987_p7 = scmp.ne.s32.totalorder %s982_s6, 0 }
 0x36a   : > { %p988_p10 = scmp.ge.s32.totalorder %s736_s21, 2  ;;  %s494_s14 = scalar_lea.sflag [#allocation4], %s493_s12 }
 0x36c   : > { %p592_p2 = pnand %p988_p10, %p987_p7 }
 0x36e   : > { %719 = dma.done.wait (!%p592_p2), %s494_s14, 128  }
 0x36f   : > { %721 = vsyncadd (!%p592_p2), %s494_s14, 4294967168  ;;  %p18_p4 = scmp.ge.s32.totalorder %s799_s24, 4   ;;  %s989_s18 = smov %s728_s19 }
 0x370   : > { %s990_s19 = smov %s732_s20  ;;  %s991_s20 = smov %s811_s27 }
 0x371   : > { %s992_s21 = smov %s799_s24  ;;  %20 = sbr.rel (!%p18_p4) target bundleno = 5 (0x5), region = 85 }
 0x378   :  { %499 = vsyncpa [#allocation3], 1 }
 0x379   :  { %501 = vsyncpa [#allocation3 + $0x1], 1 }
 0x37a   :  { %502 = vsyncpa [#allocation4], 1 }
 0x37b   :  { %504 = vsyncpa [#allocation4 + $0x1], 1 }

</bundles_post_ra>
